<compile_context>
chip_gen: v7x
topology: tpu7x:2x2x1
jax: 0.10.0
libtpu: 0.0.40
codegen_flags: <defaults>
</compile_context>

<pallas_src>
import functools

import jax
import jax.numpy as jnp
import numpy as np
from jax.experimental import pallas as pl
from jax.experimental.pallas import tpu as pltpu


def _round_up(x, m):
    return ((x + m - 1) // m) * m


def _zero_ner_stats_kernel(x_ref, out_ref, *, s4):
    """x_ref: (rows8, tn) int32 block.

    Rows [0, s4)      : OR-folded XOR(pred, tgt) words (0 <=> all 4 codes match)
    Row  s4           : sentence-invalid flag
    Row  s4+1         : format_negative count
    Row  s4+2         : span_negative count
    Rows [s4+3, rows8): zero padding

    out_ref: resident (8, tn) int32 accumulator
      rows [inv, fmt, spn, fp, tp, 0, 0, 0]; cross-lane sum happens in XLA.
    """
    pid = pl.program_id(1)

    @pl.when(pid == 0)
    def _():
        out_ref[...] = jnp.zeros_like(out_ref)

    x = x_ref[...]  # (rows8, tn) int32

    # pred == tgt  <=>  every OR-folded diff word is zero.
    diff_nz = (x[0:s4, :] != 0).astype(jnp.int32)            # (s4, tn)
    mismatch = jnp.sum(diff_nz, axis=0, keepdims=True)       # (1, tn)
    eq = (mismatch == 0).astype(jnp.int32)                   # (1, tn)

    inv_bin = (x[s4:s4 + 1, :] > 0).astype(jnp.int32)        # sentence invalid
    fmt = x[s4 + 1:s4 + 2, :]                                # format_negative count
    spn = x[s4 + 2:s4 + 3, :]                                # span_negative count

    fp = eq * inv_bin            # correct but sentence invalid
    tp = eq - fp                 # correct and valid
    # (padded lanes: diff sentinel != 0 -> eq = 0 -> fp = tp = 0; flags are 0)

    zeros3 = jnp.zeros((3, inv_bin.shape[1]), jnp.int32)
    update = jnp.concatenate([inv_bin, fmt, spn, fp, tp, zeros3], axis=0)  # (8, tn)
    out_ref[...] += update       # one unmasked full-tile accumulate


def zero_ner_stats(flags, pred_spans, tgt_spans, *, lane_tile=65536):
    """Returns int32 [8]: [invalid_sent, format_negative, span_negative,
                           false_positive, true_positive, negative, total, 0]."""
    n, s = pred_spans.shape
    assert tgt_spans.shape == (n, s)
    assert flags.shape[0] == n and flags.shape[1] >= 3

    # --- Wrapper-side fusion: full-width XOR, then OR-fold 4 words into 1. ---
    # Full int32 XOR first => no 8-bit aliasing; OR-fold preserves exactly the
    # "all four equal <=> packed word == 0" property the kernel needs, at 4x
    # fewer HBM bytes.
    diff = pred_spans.astype(jnp.int32) ^ tgt_spans.astype(jnp.int32)   # (n, s)
    s_pad4 = _round_up(max(s, 1), 4)
    diff = jnp.pad(diff, ((0, 0), (0, s_pad4 - s)))                     # zero pad = "equal"
    diff = diff.reshape(n, s_pad4 // 4, 4)
    diff4 = diff[..., 0] | diff[..., 1] | diff[..., 2] | diff[..., 3]   # (n, s4)
    s4 = s_pad4 // 4

    flags3 = flags[:, :3].astype(jnp.int32)                             # (n, 3)

    # Lane-dense layout: sentences on the 128-lane axis.
    diff_t = diff4.T                                                    # (s4, n)
    flags_t = flags3.T                                                  # (3, n)

    rows = s4 + 3
    rows8 = _round_up(rows, 8)

    # --- Tile sizing: big lane tiles, clamped by a VMEM budget and by N. ---
    vmem_budget = 24 * 1024 * 1024  # bytes; leave headroom under the scoped limit
    max_tn_vmem = vmem_budget // (4 * (2 * rows8 + 8))   # double-buffered input + resident out
    max_tn_vmem = max(128, (max_tn_vmem // 128) * 128)
    tn = min(lane_tile, max_tn_vmem, _round_up(n, 128))

    tiles = pl.cdiv(n, tn)
    num_slabs = 2 if tiles >= 2 else 1            # 2-TC split on v7x; no-op otherwise
    tiles_per_slab = pl.cdiv(tiles, num_slabs)
    total_tiles = num_slabs * tiles_per_slab
    n_pad = total_tiles * tn
    pad = n_pad - n

    # Pad lanes: diff rows get a nonzero sentinel (=> eq = 0), flags get zeros.
    diff_t = jnp.pad(diff_t, ((0, 0), (0, pad)), constant_values=1)
    flags_t = jnp.pad(flags_t, ((0, 0), (0, pad)))

    combined = jnp.concatenate([diff_t, flags_t], axis=0)               # (rows, n_pad)
    combined = jnp.pad(combined, ((0, rows8 - rows), (0, 0)))           # (rows8, n_pad)

    kernel = functools.partial(_zero_ner_stats_kernel, s4=s4)

    partial = pl.pallas_call(
        kernel,
        out_shape=jax.ShapeDtypeStruct((num_slabs, 8, tn), jnp.int32),
        grid_spec=pltpu.PrefetchScalarGridSpec(
            num_scalar_prefetch=0,
            grid=(num_slabs, tiles_per_slab),
            in_specs=[
                pl.BlockSpec((rows8, tn),
                             lambda c, i: (0, c * tiles_per_slab + i)),
            ],
            out_specs=pl.BlockSpec((None, 8, tn), lambda c, i: (c, 0, 0)),
        ),
        compiler_params=pltpu.CompilerParams(
            dimension_semantics=("parallel", "arbitrary")),
    )(combined)

    # Tiny XLA epilogue: cross-slab + cross-lane reduce, derive negative/total.
    totals = jnp.sum(partial, axis=(0, 2))                 # (8,) int32
    negative = jnp.int32(n) - totals[3] - totals[4]
    return totals.at[5].set(negative).at[6].set(jnp.int32(n))


if __name__ == "__main__":
    key = jax.random.PRNGKey(0)
    k_tgt, k_flip, k_inv, k_fmt, k_spn = jax.random.split(key, 5)

    N, S = 8, 16   # 8 sentences, 16 integer-encoded span slots per sentence

    # Deterministic synthetic "LLM outcomes".
    tgt_spans = jax.random.randint(k_tgt, (N, S), 0, 5, dtype=jnp.int32)
    # Predictions: start from target, corrupt one slot for a random subset of sentences.
    flip_sent = jax.random.bernoulli(k_flip, 0.5, (N, 1))
    corruption = jnp.where(flip_sent, 7, 0).astype(jnp.int32)  # 7 never a valid code
    pred_spans = tgt_spans.at[:, 0:1].add(corruption)

    invalid = jax.random.bernoulli(k_inv, 0.4, (N, 1)).astype(jnp.int32)
    fmt_neg = jax.random.randint(k_fmt, (N, 1), 0, 3, dtype=jnp.int32)
    spn_neg = jax.random.randint(k_spn, (N, 1), 0, 3, dtype=jnp.int32)
    flags = jnp.concatenate(
        [invalid, fmt_neg, spn_neg, jnp.zeros((N, 1), jnp.int32)], axis=1)

    stats = zero_ner_stats(flags, pred_spans, tgt_spans)
    stats = jax.block_until_ready(stats)
    stats_np = np.asarray(stats)

    # Pure-numpy reference of the module's bookkeeping semantics.
    eq = np.all(np.asarray(pred_spans) == np.asarray(tgt_spans), axis=1).astype(np.int32)
    inv = (np.asarray(invalid)[:, 0] > 0).astype(np.int32)
    ref = np.array([
        inv.sum(),
        np.asarray(fmt_neg).sum(),
        np.asarray(spn_neg).sum(),
        (eq * inv).sum(),            # false_positive
        (eq * (1 - inv)).sum(),      # true_positive
        (1 - eq).sum(),              # negative
        N,
        0,
    ], dtype=np.int32)

    assert np.array_equal(stats_np, ref), (stats_np, ref)
    # Same invariant the PyTorch module asserts:
    assert stats_np[3] + stats_np[4] + stats_np[5] == N

    print("KERNEL_OK")
</pallas_src>

<mosaic_0001>
module attributes {stable_mosaic.version = 11 : i64} {
  func.func @_zero_ner_stats_kernel(%arg0: i32, %arg1: i32, %arg2: memref<8x128xi32, #tpu.memory_space<vmem>>, %arg3: memref<1x8x128xi32, #tpu.memory_space<vmem>>) attributes {dimension_semantics = [#tpu.dimension_semantics<parallel>, #tpu.dimension_semantics<arbitrary>], iteration_bounds = array<i64: 1, 1>, scalar_prefetch = 0 : i64, scratch_operands = 0 : i64, tpu.core_type = #tpu.core_type<tc>, window_params = [{transform_indices = @transform_0, window_bounds = array<i64: 8, 128>}, {transform_indices = @transform_1, window_bounds = array<i64: 1, 8, 128>}]} {
    %c0_i32 = arith.constant 0 : i32
    %0 = arith.cmpi eq, %arg1, %c0_i32 : i32
    %1 = arith.extui %0 : i1 to i32
    %c0_i32_0 = arith.constant 0 : i32
    %2 = arith.cmpi ne, %1, %c0_i32_0 : i32
    scf.if %2 {
      %c0_i32_12 = arith.constant 0 : i32
      %29 = vector.broadcast %c0_i32_12 : i32 to vector<8x128xi32>
      %c0_13 = arith.constant 0 : index
      %c0_14 = arith.constant 0 : index
      %c0_15 = arith.constant 0 : index
      %30 = vector.load %arg3[%c0_13, %c0_14, %c0_15] : memref<1x8x128xi32, #tpu.memory_space<vmem>>, vector<1x8x128xi32>
      %31 = vector.shape_cast %30 : vector<1x8x128xi32> to vector<8x128xi32>
      %32 = vector.shape_cast %29 : vector<8x128xi32> to vector<1x8x128xi32>
      tpu.vector_store %arg3[%c0_13, %c0_14, %c0_15], %32 {strides = array<i32>} : memref<1x8x128xi32, #tpu.memory_space<vmem>>, vector<1x8x128xi32>,
    } else {
    }
    %c0 = arith.constant 0 : index
    %c0_1 = arith.constant 0 : index
    %3 = vector.load %arg2[%c0, %c0_1] : memref<8x128xi32, #tpu.memory_space<vmem>>, vector<8x128xi32>
    %4 = vector.extract_strided_slice %3 {offsets = [0, 0], sizes = [4, 128], strides = [1, 1]} : vector<8x128xi32> to vector<4x128xi32>
    %c0_i32_2 = arith.constant 0 : i32
    %5 = vector.broadcast %c0_i32_2 : i32 to vector<4x128xi32>
    %6 = arith.cmpi ne, %4, %5 : vector<4x128xi32>
    %7 = arith.extui %6 : vector<4x128xi1> to vector<4x128xi32>
    %cst = arith.constant dense<0> : vector<128xi32>
    %8 = vector.multi_reduction <add>, %7, %cst [0] : vector<4x128xi32> to vector<128xi32>
    %9 = vector.shape_cast %8 : vector<128xi32> to vector<1x128xi32>
    %c0_i32_3 = arith.constant 0 : i32
    %10 = vector.broadcast %c0_i32_3 : i32 to vector<1x128xi32>
    %11 = arith.cmpi eq, %9, %10 : vector<1x128xi32>
    %12 = arith.extui %11 : vector<1x128xi1> to vector<1x128xi32>
    %13 = vector.extract_strided_slice %3 {offsets = [4, 0], sizes = [1, 128], strides = [1, 1]} : vector<8x128xi32> to vector<1x128xi32>
    %c0_i32_4 = arith.constant 0 : i32
    %14 = vector.broadcast %c0_i32_4 : i32 to vector<1x128xi32>
    %15 = arith.cmpi sgt, %13, %14 : vector<1x128xi32>
    %16 = arith.extui %15 : vector<1x128xi1> to vector<1x128xi32>
    %17 = vector.extract_strided_slice %3 {offsets = [5, 0], sizes = [1, 128], strides = [1, 1]} : vector<8x128xi32> to vector<1x128xi32>
    %18 = vector.extract_strided_slice %3 {offsets = [6, 0], sizes = [1, 128], strides = [1, 1]} : vector<8x128xi32> to vector<1x128xi32>
    %19 = arith.muli %12, %16 : vector<1x128xi32>
    %20 = arith.subi %12, %19 : vector<1x128xi32>
    %c0_i32_5 = arith.constant 0 : i32
    %21 = vector.broadcast %c0_i32_5 : i32 to vector<3x128xi32>
    %22 = tpu.concatenate %16, %17, %18, %19, %20, %21 in 0 : vector<1x128xi32>, vector<1x128xi32>, vector<1x128xi32>, vector<1x128xi32>, vector<1x128xi32>, vector<3x128xi32> -> vector<8x128xi32>
    %c0_6 = arith.constant 0 : index
    %c0_7 = arith.constant 0 : index
    %c0_8 = arith.constant 0 : index
    %23 = vector.load %arg3[%c0_6, %c0_7, %c0_8] : memref<1x8x128xi32, #tpu.memory_space<vmem>>, vector<1x8x128xi32>
    %24 = vector.shape_cast %23 : vector<1x8x128xi32> to vector<8x128xi32>
    %25 = arith.addi %24, %22 : vector<8x128xi32>
    %c0_9 = arith.constant 0 : index
    %c0_10 = arith.constant 0 : index
    %c0_11 = arith.constant 0 : index
    %26 = vector.load %arg3[%c0_9, %c0_10, %c0_11] : memref<1x8x128xi32, #tpu.memory_space<vmem>>, vector<1x8x128xi32>
    %27 = vector.shape_cast %26 : vector<1x8x128xi32> to vector<8x128xi32>
    %28 = vector.shape_cast %25 : vector<8x128xi32> to vector<1x8x128xi32>
    tpu.vector_store %arg3[%c0_9, %c0_10, %c0_11], %28 {strides = array<i32>} : memref<1x8x128xi32, #tpu.memory_space<vmem>>, vector<1x8x128xi32>,
    return
  }
  func.func @transform_0(%arg0: i32, %arg1: i32) -> (i32, i32) {
    %c1_i32 = arith.constant 1 : i32
    %0 = arith.muli %arg0, %c1_i32 : i32
    %1 = arith.addi %0, %arg1 : i32
    %c0_i32 = arith.constant 0 : i32
    %c0_i32_0 = arith.constant 0 : i32
    return %c0_i32, %1 : i32, i32
  }
  func.func @transform_1(%arg0: i32, %arg1: i32) -> (i32, i32, i32) {
    %c0_i32 = arith.constant 0 : i32
    %c0_i32_0 = arith.constant 0 : i32
    %c0_i32_1 = arith.constant 0 : i32
    return %arg0, %c0_i32, %c0_i32_0 : i32, i32, i32
  }
}

</mosaic_0001>

<bundles_post_ra>
// kernel: tpu_custom_call.1
= control target key start
LH: loop header
LB: loop body
LE: loop exit
PB: predicated region body
PF: predicated region fallthrough
CT: control target
= control target key end

     0   :  { %6 = vsyncpa [#allocation3], 0  ;;  %s167_s0 = inlined_call_operand.hbm [shape: s32[8,128], index: 0, kind: input, shape index: {}]   ;;  %s168_s1 = inlined_call_operand.hbm [shape: s32[1,8,128], index: 1, kind: output, shape index: {}]  }
   0x1   :  { %7 = vsyncpa [#allocation4], 0  ;;  %s128_s6 = smov [#allocation2]   ;;  %s80_s10 = scalar_lea.hbm %s167_s0, 128 }
   0x2   :  { %s17_s7 = sshll.u32 %s128_s6, 4  ;;  %p81_p0 = scmp.ne.s32.totalorder %s167_s0, %s80_s10  ;;  %s18_s7 = int_to_ptr.vmem [resolvable:$true] %s17_s7 }
   0x3   :  { %p84_p1 = scmp.lt.u32.totalorder %s80_s10, %s167_s0 }
   0x5   :  { %p86_p2 = pnand %p84_p1, %p81_p0 }
   0x7   :  { %89 = shalt.err (!%p86_p2)
}
   0x8   :  { %s90_s15 = scalar_lea.vmem %s18_s7, 128  ;;  %p95_p4 = scmp.lt.s32.totalorder %s18_s7, %s18_s7 }
   0x9   :  { %p91_p3 = scmp.ne.s32.totalorder %s18_s7, %s90_s15  ;;  %p96_p5 = scmp.lt.s32.totalorder %s90_s15, %s90_s15 }
   0xb   :  { %p97_p6 = por %p96_p5, %p95_p4 }
   0xd   :  { %p98_p7 = pnand %p97_p6, %p91_p3 }
   0xf   :  { %101 = shalt.err (!%p98_p7)
}
  0x10   :  { %20 = dma.hbm_to_vmem [thread:$0]  %s167_s0, 128, %s18_s7, [#allocation3]  }
  0x11   :  { %124 = dma.done.wait [#allocation3], 128  }
  0x12   :  { %125 = vsyncadd [#allocation3], 4294967168  ;;  %v30_v0 = vld [vmem:[#allocation2] sm:$0xff]  ;;  %vm33_vm0 = vcmask 1043456   ;;  %v129_v1 = vmov 0   ;;  %vm50_vm3 = vcmask 1040384  }
  0x13   :  { %vm31_vm1 = vcmp.ne.s32.totalorder %v30_v0, 0  ;;  %vm43_vm2 = vcmp.gt.s32.totalorder %v30_v0, 0  ;;  %v48_v11 = vrot.slane %v30_v0, 4  ;;  %vm52_vm5 = vcmask 1041408   ;;  %s130_s0 = smov [#allocation5]  }
  0x14   :  { %v32_v2 = vsel %vm31_vm1, 1, %v129_v1  ;;  %v44_v7 = vsel %vm43_vm2, 1, %v129_v1  ;;  %vm54_vm6 = vcmask 1042432   ;;  %vm57_vm7 = vcmask 1044480   ;;  %s68_s18 = sshll.u32 %s130_s0, 4  ;;  %s69_s18 = int_to_ptr.vmem [resolvable:$true] %s68_s18 }
  0x15   :  { %v34_v3 = vsel %vm33_vm0, %v32_v2, 0  ;;  %v47_v10 = vrot.slane %v44_v7, 4  ;;  %s102_s19 = scalar_lea.vmem %s69_s18, 128  ;;  %p107_p9 = scmp.lt.s32.totalorder %s69_s18, %s69_s18 }
  0x16   :  { %v35_v4 = vrot.slane %v34_v3, 4  ;;  %p103_p8 = scmp.ne.s32.totalorder %s69_s18, %s102_s19  ;;  %p108_p10 = scmp.lt.s32.totalorder %s102_s19, %s102_s19 }
  0x17   :  { %v51_v13 = vsel %vm50_vm3, %v47_v10, %v48_v11 }
  0x18   :  { %v36_v5 = vadd.s32 %v35_v4, %v34_v3  ;;  %v53_v16 = vsel %vm52_vm5, %v51_v13, %v48_v11  ;;  %p109_p11 = por %p108_p10, %p107_p9 }
  0x1a   :  { %v37_v6 = vrot.slane %v36_v5, 2  ;;  %p110_p12 = pnand %p109_p11, %p103_p8 }
  0x1c   :  { %v38_v8 = vadd.s32 %v37_v6, %v36_v5 }
  0x1e   :  { %v39_v9 = vrot.slane %v38_v8, 1 }
  0x20   :  { %v40_v12 = vadd.s32 %v39_v9, %v38_v8 }
  0x22   :  { %vm41_vm4 = vcmp.eq.s32.totalorder %v40_v12, 0 }
  0x23   :  { %v42_v14 = vsel %vm41_vm4, 1, %v129_v1 }
  0x24   :  { %v45_v15 = vmul.u32 %v44_v7, %v42_v14 }
  0x26   :  { %v46_v17 = vsub.s32 %v42_v14, %v45_v15  ;;  %v49_v18 = vrot.slane %v45_v15, 1 }
  0x28   :  { %v55_v19 = vsel %vm54_vm6, %v53_v16, %v49_v18 }
  0x29   :  { %v56_v20 = vsel %vm33_vm0, %v55_v19, %v46_v17 }
  0x2a   :  { %v58_v21 = vsel %vm57_vm7, %v56_v20, 0 }
  0x2b   :  { %61 = vst [vmem:[#allocation5] sm:$0xff] %v58_v21 }
  0x2c   :  { %113 = shalt.err (!%p110_p12)
}
  0x2d   :  { %s114_s22 = scalar_lea.hbm %s168_s1, 128 }
  0x2e   :  { %p115_p13 = scmp.ne.s32.totalorder %s168_s1, %s114_s22  ;;  %p118_p0 = scmp.lt.u32.totalorder %s114_s22, %s168_s1 }
  0x30   :  { %p120_p1 = pnand %p118_p0, %p115_p13 }
  0x32   :  { %123 = shalt.err (!%p120_p1)
}
  0x33   :  { %71 = dma.vmem_to_hbm [thread:$0]  %s69_s18, 128, %s168_s1, [#allocation4]  }
  0x34   :  { %126 = dma.done.wait [#allocation4], 128  }
  0x35   :  { %127 = vsyncadd [#allocation4], 4294967168 }
  0x36   :  { %75 = vsyncpa [#allocation3], 1 }
  0x37   :  { %76 = vsyncpa [#allocation4], 1 }

</bundles_post_ra>
